<compile_context>
chip_gen: v5e
topology: v5e:2x2
jax: 0.10.0
libtpu: 0.0.40
codegen_flags: <defaults>
</compile_context>

<pallas_src>
import functools

import jax
import jax.numpy as jnp
from jax.experimental import pallas as pl
from jax.experimental.pallas import tpu as pltpu

# ----------------------------- hyper-parameters ------------------------------
B = 2         # batch
R = 4         # reviews per user / per item
L = 16        # words per review
D = 32        # word embedding dim
F = 32        # conv filters
WINDOW = 3    # conv window over words
A = 32        # attention hidden dim
KID = 32      # id-embedding dim used inside review attention
K = 16        # latent-factor dim (fc output / free id embedding dim)
VOCAB = 50
USER_NUMS = 8
ITEM_NUMS = 10

T = L - WINDOW + 1          # valid conv positions (14)
TP = 16                     # conv positions padded to a multiple of 8
RP = 8                      # reviews padded to a multiple of 8
WD = WINDOW * D             # im2col contraction depth (96)
KP = 128                    # lane-dense padded feature width


# ----------------------------- Pallas kernel ---------------------------------
def fused_encoder_kernel(x_ref, ids_ref, wconv_ref, watt_ref, wfc_ref, bias_ref,
                         feat_out_ref, tip_out_ref):
    """One encoder (user or item) per grid step.

    x_ref     : (1, B*RP*TP, WD)  bf16  im2col'd word embeddings (padded rows are 0)
    ids_ref   : (1, B*RP, KID)    bf16  per-review id embeddings of the other entity
    wconv_ref : (1, WD, F)        bf16  conv weight, reshaped (WINDOW*D, F)
    watt_ref  : (1, F+KID, A)     bf16  fused attention projection [wo ; wid]
    wfc_ref   : (1, F, KP)        bf16  fc weight, zero-padded to 128 output lanes
    bias_ref  : (1, 4, KP)        f32   rows: [bconv | b1 | bfc | h], zero padded
    feat_out_ref : (1, B, KP) f32 ; tip_out_ref : (1, B, 1) int32
    """
    bias = bias_ref[0]                                 # (4, KP) f32
    bconv = bias[0:1, :F]                              # (1, F)
    b1 = bias[1:2, :A]                                 # (1, A)
    bfc = bias[2:3, :]                                 # (1, KP)
    h = bias[3:4, :A]                                  # (1, A)

    # ---- word-level CNN as ONE im2col matmul + ReLU + max-over-words pool ----
    x = x_ref[0]                                       # (B*RP*TP, WD)
    conv = jnp.dot(x, wconv_ref[0],
                   preferred_element_type=jnp.float32)  # (B*RP*TP, F)
    conv = jnp.maximum(conv + bconv, 0.0)
    conv = conv.reshape(B * RP, TP, F)                  # layout no-op (TP=16)
    t_ok = jax.lax.broadcasted_iota(jnp.int32, (B * RP, TP, F), 1) < T
    # ReLU output >= 0, so masking padded positions to 0 leaves the max exact.
    feats = jnp.max(jnp.where(t_ok, conv, 0.0), axis=1)  # (B*RP, F)

    # ---- review-level attention: fused [feats | ids] projection ----
    za = jnp.concatenate([feats.astype(jnp.bfloat16), ids_ref[0]], axis=-1)  # (B*RP, F+KID)
    hidden = jnp.maximum(
        jnp.dot(za, watt_ref[0], preferred_element_type=jnp.float32) + b1, 0.0)  # (B*RP, A)
    scores = jnp.sum(hidden * h, axis=-1, keepdims=True)   # (B*RP, 1)  VPU reduce

    sc = scores.reshape(B, RP, 1)                           # layout no-op (RP=8)
    r_ok = jax.lax.broadcasted_iota(jnp.int32, (B, RP, 1), 1) < R
    sc = jnp.where(r_ok, sc, -1e30)                          # mask padded reviews
    m = jnp.max(sc, axis=1, keepdims=True)                   # (B, 1, 1)
    e = jnp.exp(sc - m)
    att = e * pl.reciprocal(jnp.sum(e, axis=1, keepdims=True), approx=True)  # (B, RP, 1)

    feats3 = feats.reshape(B, RP, F)                          # layout no-op
    weighted = jnp.sum(att * feats3, axis=1)                  # (B, F)

    # ---- fc to latent dim (lane-dense, K padded to 128) ----
    feat_out_ref[0] = (jnp.dot(weighted.astype(jnp.bfloat16), wfc_ref[0],
                               preferred_element_type=jnp.float32) + bfc)  # (B, KP)

    # ---- tip review index = first argmax over attention scores ----
    iota_r = jax.lax.broadcasted_iota(jnp.int32, (B, RP, 1), 1)
    tip = jnp.min(jnp.where(sc >= m, iota_r, jnp.int32(R)), axis=1)  # (B, 1)
    tip_out_ref[0] = tip


# ----------------------------- wrappers ---------------------------------------
def _im2col(rev_emb):
    """(B, R, L, D) word embeddings -> (B*RP*TP, WINDOW*D) im2col matrix."""
    win = jnp.stack([rev_emb[:, :, w:w + T, :] for w in range(WINDOW)], axis=3)  # (B,R,T,W,D)
    win = win.reshape(B, R, T, WD)
    win = jnp.pad(win, ((0, 0), (0, RP - R), (0, TP - T), (0, 0)))               # (B,RP,TP,WD)
    return win.reshape(B * RP * TP, WD)


def _pack_encoder_weights(p):
    wconv = p["wconv"].reshape(WD, F)
    watt = jnp.concatenate([p["wo"], p["wid"]], axis=0)          # (F+KID, A)
    wfc = jnp.pad(p["wfc"], ((0, 0), (0, KP - K)))               # (F, KP)
    bias = jnp.zeros((4, KP), jnp.float32)
    bias = bias.at[0, :F].set(p["bconv"][0])
    bias = bias.at[1, :A].set(p["b1"][0])
    bias = bias.at[2, :K].set(p["bfc"][0])
    bias = bias.at[3, :A].set(p["h"][:, 0])
    return wconv, watt, wfc, bias


def fused_review_encoders(u_rev_emb, u_att_ids, p_user, i_rev_emb, i_att_ids, p_item):
    """Runs user + item ReviewEncoders in one pallas_call (grid over encoder)."""
    x = jnp.stack([_im2col(u_rev_emb), _im2col(i_rev_emb)], axis=0).astype(jnp.bfloat16)

    def pad_ids(ids):
        return jnp.pad(ids, ((0, 0), (0, RP - R), (0, 0))).reshape(B * RP, KID)

    ids = jnp.stack([pad_ids(u_att_ids), pad_ids(i_att_ids)], axis=0).astype(jnp.bfloat16)

    wu = _pack_encoder_weights(p_user)
    wi = _pack_encoder_weights(p_item)
    wconv = jnp.stack([wu[0], wi[0]], axis=0).astype(jnp.bfloat16)   # (2, WD, F)
    watt = jnp.stack([wu[1], wi[1]], axis=0).astype(jnp.bfloat16)    # (2, F+KID, A)
    wfc = jnp.stack([wu[2], wi[2]], axis=0).astype(jnp.bfloat16)     # (2, F, KP)
    bias = jnp.stack([wu[3], wi[3]], axis=0)                         # (2, 4, KP) f32

    feat, tip = pl.pallas_call(
        fused_encoder_kernel,
        grid=(2,),
        in_specs=[
            pl.BlockSpec((1, B * RP * TP, WD), lambda e: (e, 0, 0)),
            pl.BlockSpec((1, B * RP, KID), lambda e: (e, 0, 0)),
            pl.BlockSpec((1, WD, F), lambda e: (e, 0, 0)),
            pl.BlockSpec((1, F + KID, A), lambda e: (e, 0, 0)),
            pl.BlockSpec((1, F, KP), lambda e: (e, 0, 0)),
            pl.BlockSpec((1, 4, KP), lambda e: (e, 0, 0)),
        ],
        out_specs=(
            pl.BlockSpec((1, B, KP), lambda e: (e, 0, 0)),
            pl.BlockSpec((1, B, 1), lambda e: (e, 0, 0)),
        ),
        out_shape=(
            jax.ShapeDtypeStruct((2, B, KP), jnp.float32),
            jax.ShapeDtypeStruct((2, B, 1), jnp.int32),
        ),
        compiler_params=pltpu.CompilerParams(dimension_semantics=("parallel",)),
    )(x, ids, wconv, watt, wfc, bias)

    user_feature = feat[0, :, :K]
    item_feature = feat[1, :, :K]
    user_tip = tip[0, :, 0]
    item_tip = tip[1, :, 0]
    return user_feature, user_tip, item_feature, item_tip


def init_params(key):
    ks = jax.random.split(key, 8)

    def enc(k0, n_att_ids):
        kk = jax.random.split(k0, 6)
        return dict(
            wconv=0.1 * jax.random.normal(kk[0], (WINDOW, D, F), jnp.float32),
            bconv=jnp.zeros((1, F), jnp.float32),
            wo=0.1 * jax.random.normal(kk[1], (F, A), jnp.float32),
            wid=0.1 * jax.random.normal(kk[2], (KID, A), jnp.float32),
            b1=jnp.zeros((1, A), jnp.float32),
            h=0.1 * jax.random.normal(kk[3], (A, 1), jnp.float32),
            wfc=0.1 * jax.random.normal(kk[4], (F, K), jnp.float32),
            bfc=jnp.zeros((1, K), jnp.float32),
            id_emb=0.1 * jax.random.normal(kk[5], (n_att_ids, KID), jnp.float32),
        )

    return dict(
        w2v=0.1 * jax.random.normal(ks[0], (VOCAB, D), jnp.float32),   # frozen w2v weights
        user_enc=enc(ks[1], ITEM_NUMS + 1),   # attention keyed by item ids
        item_enc=enc(ks[2], USER_NUMS + 1),   # attention keyed by user ids
        lf=dict(
            user_emb=0.1 * jax.random.normal(ks[3], (USER_NUMS, K), jnp.float32),
            item_emb=0.1 * jax.random.normal(ks[4], (ITEM_NUMS, K), jnp.float32),
            user_bias=0.01 * jax.random.normal(ks[5], (USER_NUMS,), jnp.float32),
            item_bias=0.01 * jax.random.normal(ks[6], (ITEM_NUMS,), jnp.float32),
            w_fm=0.1 * jax.random.normal(ks[7], (K, 1), jnp.float32),
            mu=jnp.full((1, 1), 3.0, jnp.float32),
        ),
    )


def narre_forward(params, user_review, user_id, item_id_per_review,
                  item_review, item_id, user_id_per_review):
    # embedding lookups = glue (gathers) in plain JAX
    u_rev_emb = jnp.take(params["w2v"], user_review, axis=0)            # (B,R,L,D)
    i_rev_emb = jnp.take(params["w2v"], item_review, axis=0)            # (B,R,L,D)
    u_att_ids = jnp.take(params["user_enc"]["id_emb"], item_id_per_review, axis=0)  # (B,R,KID)
    i_att_ids = jnp.take(params["item_enc"]["id_emb"], user_id_per_review, axis=0)  # (B,R,KID)

    user_feature, user_tip, item_feature, item_tip = fused_review_encoders(
        u_rev_emb, u_att_ids, params["user_enc"],
        i_rev_emb, i_att_ids, params["item_enc"])

    # FM-style LatentFactor head: trivially small -> plain JAX/XLA (per perf review)
    lf = params["lf"]
    u_free = jnp.take(lf["user_emb"], user_id, axis=0)                  # (B,K)
    i_free = jnp.take(lf["item_emb"], item_id, axis=0)                  # (B,K)
    b_u = jnp.take(lf["user_bias"], user_id)[:, None]                   # (B,1)
    b_i = jnp.take(lf["item_bias"], item_id)[:, None]                   # (B,1)
    inter = (user_feature + u_free) * (item_feature + i_free)           # (B,K)
    predict = jnp.dot(inter, lf["w_fm"]) + b_u + b_i + lf["mu"]         # (B,1)

    # torch: user_review.gather(1, user_tip_index).squeeze()
    u_tip_idx = jnp.broadcast_to(user_tip[:, None, None], (B, 1, L))
    i_tip_idx = jnp.broadcast_to(item_tip[:, None, None], (B, 1, L))
    user_tip_seq = jnp.take_along_axis(user_review, u_tip_idx, axis=1)[:, 0, :]
    item_tip_seq = jnp.take_along_axis(item_review, i_tip_idx, axis=1)[:, 0, :]

    return (jnp.squeeze(predict), jnp.squeeze(user_tip_seq), jnp.squeeze(item_tip_seq))


if __name__ == "__main__":
    key = jax.random.PRNGKey(0)
    kp, k1, k2, k3, k4, k5, k6 = jax.random.split(key, 7)

    params = init_params(kp)

    user_review = jax.random.randint(k1, (B, R, L), 0, VOCAB, dtype=jnp.int32)
    item_review = jax.random.randint(k2, (B, R, L), 0, VOCAB, dtype=jnp.int32)
    user_id = jax.random.randint(k3, (B,), 0, USER_NUMS, dtype=jnp.int32)
    item_id = jax.random.randint(k4, (B,), 0, ITEM_NUMS, dtype=jnp.int32)
    item_id_per_review = jax.random.randint(k5, (B, R), 0, ITEM_NUMS + 1, dtype=jnp.int32)
    user_id_per_review = jax.random.randint(k6, (B, R), 0, USER_NUMS + 1, dtype=jnp.int32)

    fwd = jax.jit(functools.partial(narre_forward, params))
    predict, user_tip_seq, item_tip_seq = fwd(user_review, user_id, item_id_per_review,
                                              item_review, item_id, user_id_per_review)
    jax.block_until_ready((predict, user_tip_seq, item_tip_seq))

    assert predict.shape == (B,)
    assert user_tip_seq.shape == (B, L)
    assert item_tip_seq.shape == (B, L)
    print("KERNEL_OK")
</pallas_src>

<mosaic_0001>
module attributes {stable_mosaic.version = 11 : i64} {
  func.func @fused_encoder_kernel(%arg0: i32, %arg1: memref<1x256x96xbf16, #tpu.memory_space<vmem>>, %arg2: memref<1x16x32xbf16, #tpu.memory_space<vmem>>, %arg3: memref<1x96x32xbf16, #tpu.memory_space<vmem>>, %arg4: memref<1x64x32xbf16, #tpu.memory_space<vmem>>, %arg5: memref<1x32x128xbf16, #tpu.memory_space<vmem>>, %arg6: memref<1x4x128xf32, #tpu.memory_space<vmem>>, %arg7: memref<1x2x128xf32, #tpu.memory_space<vmem>>, %arg8: memref<1x2x1xi32, #tpu.memory_space<vmem>>) attributes {dimension_semantics = [#tpu.dimension_semantics<parallel>], iteration_bounds = array<i64: 2>, scalar_prefetch = 0 : i64, scratch_operands = 0 : i64, tpu.core_type = #tpu.core_type<tc>, window_params = [{transform_indices = @transform_0, window_bounds = array<i64: 1, 256, 96>}, {transform_indices = @transform_1, window_bounds = array<i64: 1, 16, 32>}, {transform_indices = @transform_2, window_bounds = array<i64: 1, 96, 32>}, {transform_indices = @transform_3, window_bounds = array<i64: 1, 64, 32>}, {transform_indices = @transform_4, window_bounds = array<i64: 1, 32, 128>}, {transform_indices = @transform_5, window_bounds = array<i64: 1, 4, 128>}, {transform_indices = @transform_6, window_bounds = array<i64: 1, 2, 128>}, {transform_indices = @transform_7, window_bounds = array<i64: 1, 2, 1>}]} {
    %c0 = arith.constant 0 : index
    %c0_0 = arith.constant 0 : index
    %c0_1 = arith.constant 0 : index
    %0 = vector.load %arg6[%c0, %c0_0, %c0_1] : memref<1x4x128xf32, #tpu.memory_space<vmem>>, vector<1x4x128xf32>
    %1 = vector.shape_cast %0 : vector<1x4x128xf32> to vector<4x128xf32>
    %2 = vector.extract_strided_slice %1 {offsets = [0, 0], sizes = [1, 32], strides = [1, 1]} : vector<4x128xf32> to vector<1x32xf32>
    %3 = vector.extract_strided_slice %1 {offsets = [1, 0], sizes = [1, 32], strides = [1, 1]} : vector<4x128xf32> to vector<1x32xf32>
    %4 = vector.extract_strided_slice %1 {offsets = [2, 0], sizes = [1, 128], strides = [1, 1]} : vector<4x128xf32> to vector<1x128xf32>
    %5 = vector.extract_strided_slice %1 {offsets = [3, 0], sizes = [1, 32], strides = [1, 1]} : vector<4x128xf32> to vector<1x32xf32>
    %c0_2 = arith.constant 0 : index
    %c0_3 = arith.constant 0 : index
    %c0_4 = arith.constant 0 : index
    %6 = vector.load %arg1[%c0_2, %c0_3, %c0_4] : memref<1x256x96xbf16, #tpu.memory_space<vmem>>, vector<1x256x96xbf16>
    %7 = vector.shape_cast %6 : vector<1x256x96xbf16> to vector<256x96xbf16>
    %c0_5 = arith.constant 0 : index
    %c0_6 = arith.constant 0 : index
    %c0_7 = arith.constant 0 : index
    %8 = vector.load %arg3[%c0_5, %c0_6, %c0_7] : memref<1x96x32xbf16, #tpu.memory_space<vmem>>, vector<1x96x32xbf16>
    %9 = vector.shape_cast %8 : vector<1x96x32xbf16> to vector<96x32xbf16>
    %cst = arith.constant dense<0.000000e+00> : vector<256x32xf32>
    %10 = tpu.matmul %7, %9, %cst {dimension_numbers = #tpu.dot_dimension_numbers<[1], [0], [0], [1], [0, 0, 1, 1], [], []>} : vector<256x96xbf16>, vector<96x32xbf16>, vector<256x32xf32> -> vector<256x32xf32>
    %11 = vector.broadcast %2 : vector<1x32xf32> to vector<256x32xf32>
    %12 = arith.addf %10, %11 : vector<256x32xf32>
    %cst_8 = arith.constant 0.000000e+00 : f32
    %13 = vector.broadcast %cst_8 : f32 to vector<256x32xf32>
    %14 = arith.maximumf %12, %13 : vector<256x32xf32>
    %15 = vector.shape_cast %14 : vector<256x32xf32> to vector<16x16x32xf32>
    %16 = tpu.iota {dimensions = array<i32: 1>} : vector<16x16x32xi32>
    %c14_i32 = arith.constant 14 : i32
    %17 = vector.broadcast %c14_i32 : i32 to vector<16x16x32xi32>
    %18 = arith.cmpi slt, %16, %17 : vector<16x16x32xi32>
    %cst_9 = arith.constant 0.000000e+00 : f32
    %19 = vector.broadcast %cst_9 : f32 to vector<16x16x32xf32>
    %20 = arith.select %18, %15, %19 : vector<16x16x32xi1>, vector<16x16x32xf32>
    %cst_10 = arith.constant dense<0xFF800000> : vector<16x32xf32>
    %21 = vector.multi_reduction <maximumf>, %20, %cst_10 [1] : vector<16x16x32xf32> to vector<16x32xf32>
    %22 = arith.truncf %21 : vector<16x32xf32> to vector<16x32xbf16>
    %c0_11 = arith.constant 0 : index
    %c0_12 = arith.constant 0 : index
    %c0_13 = arith.constant 0 : index
    %23 = vector.load %arg2[%c0_11, %c0_12, %c0_13] : memref<1x16x32xbf16, #tpu.memory_space<vmem>>, vector<1x16x32xbf16>
    %24 = vector.shape_cast %23 : vector<1x16x32xbf16> to vector<16x32xbf16>
    %25 = tpu.concatenate %22, %24 in 1 : vector<16x32xbf16>, vector<16x32xbf16> -> vector<16x64xbf16>
    %c0_14 = arith.constant 0 : index
    %c0_15 = arith.constant 0 : index
    %c0_16 = arith.constant 0 : index
    %26 = vector.load %arg4[%c0_14, %c0_15, %c0_16] : memref<1x64x32xbf16, #tpu.memory_space<vmem>>, vector<1x64x32xbf16>
    %27 = vector.shape_cast %26 : vector<1x64x32xbf16> to vector<64x32xbf16>
    %cst_17 = arith.constant dense<0.000000e+00> : vector<16x32xf32>
    %28 = tpu.matmul %25, %27, %cst_17 {dimension_numbers = #tpu.dot_dimension_numbers<[1], [0], [0], [1], [0, 0, 1, 1], [], []>} : vector<16x64xbf16>, vector<64x32xbf16>, vector<16x32xf32> -> vector<16x32xf32>
    %29 = vector.broadcast %3 : vector<1x32xf32> to vector<16x32xf32>
    %30 = arith.addf %28, %29 : vector<16x32xf32>
    %cst_18 = arith.constant 0.000000e+00 : f32
    %31 = vector.broadcast %cst_18 : f32 to vector<16x32xf32>
    %32 = arith.maximumf %30, %31 : vector<16x32xf32>
    %33 = vector.broadcast %5 : vector<1x32xf32> to vector<16x32xf32>
    %34 = arith.mulf %32, %33 : vector<16x32xf32>
    %cst_19 = arith.constant dense<0.000000e+00> : vector<16xf32>
    %35 = vector.multi_reduction <add>, %34, %cst_19 [1] : vector<16x32xf32> to vector<16xf32>
    %36 = vector.shape_cast %35 : vector<16xf32> to vector<16x1xf32>
    %37 = vector.shape_cast %36 : vector<16x1xf32> to vector<2x8x1xf32>
    %38 = tpu.iota {dimensions = array<i32: 1>} : vector<2x8x1xi32>
    %c4_i32 = arith.constant 4 : i32
    %39 = vector.broadcast %c4_i32 : i32 to vector<2x8x1xi32>
    %40 = arith.cmpi slt, %38, %39 : vector<2x8x1xi32>
    %cst_20 = arith.constant -1.000000e+30 : f32
    %41 = vector.broadcast %cst_20 : f32 to vector<2x8x1xf32>
    %42 = arith.select %40, %37, %41 : vector<2x8x1xi1>, vector<2x8x1xf32>
    %cst_21 = arith.constant dense<0xFF800000> : vector<2x1xf32>
    %43 = vector.multi_reduction <maximumf>, %42, %cst_21 [1] : vector<2x8x1xf32> to vector<2x1xf32>
    %44 = vector.shape_cast %43 : vector<2x1xf32> to vector<2x1x1xf32>
    %45 = vector.broadcast %44 : vector<2x1x1xf32> to vector<2x8x1xf32>
    %46 = arith.subf %42, %45 : vector<2x8x1xf32>
    %47 = math.exp %46 : vector<2x8x1xf32>
    %cst_22 = arith.constant dense<0.000000e+00> : vector<2x1xf32>
    %48 = vector.multi_reduction <add>, %47, %cst_22 [1] : vector<2x8x1xf32> to vector<2x1xf32>
    %49 = vector.shape_cast %48 : vector<2x1xf32> to vector<2x1x1xf32>
    %50 = tpu.reciprocal %49 {approx = true} : vector<2x1x1xf32> -> vector<2x1x1xf32>
    %51 = vector.broadcast %50 : vector<2x1x1xf32> to vector<2x8x1xf32>
    %52 = arith.mulf %47, %51 : vector<2x8x1xf32>
    %53 = vector.shape_cast %21 : vector<16x32xf32> to vector<2x8x32xf32>
    %54 = vector.broadcast %52 : vector<2x8x1xf32> to vector<2x8x32xf32>
    %55 = arith.mulf %54, %53 : vector<2x8x32xf32>
    %cst_23 = arith.constant dense<0.000000e+00> : vector<2x32xf32>
    %56 = vector.multi_reduction <add>, %55, %cst_23 [1] : vector<2x8x32xf32> to vector<2x32xf32>
    %57 = arith.truncf %56 : vector<2x32xf32> to vector<2x32xbf16>
    %c0_24 = arith.constant 0 : index
    %c0_25 = arith.constant 0 : index
    %c0_26 = arith.constant 0 : index
    %58 = vector.load %arg5[%c0_24, %c0_25, %c0_26] : memref<1x32x128xbf16, #tpu.memory_space<vmem>>, vector<1x32x128xbf16>
    %59 = vector.shape_cast %58 : vector<1x32x128xbf16> to vector<32x128xbf16>
    %cst_27 = arith.constant dense<0.000000e+00> : vector<2x128xf32>
    %60 = tpu.matmul %57, %59, %cst_27 {dimension_numbers = #tpu.dot_dimension_numbers<[1], [0], [0], [1], [0, 0, 1, 1], [], []>} : vector<2x32xbf16>, vector<32x128xbf16>, vector<2x128xf32> -> vector<2x128xf32>
    %61 = vector.broadcast %4 : vector<1x128xf32> to vector<2x128xf32>
    %62 = arith.addf %60, %61 : vector<2x128xf32>
    %c0_28 = arith.constant 0 : index
    %c0_29 = arith.constant 0 : index
    %c0_30 = arith.constant 0 : index
    %63 = vector.load %arg7[%c0_28, %c0_29, %c0_30] : memref<1x2x128xf32, #tpu.memory_space<vmem>>, vector<1x2x128xf32>
    %64 = vector.shape_cast %63 : vector<1x2x128xf32> to vector<2x128xf32>
    %65 = vector.shape_cast %62 : vector<2x128xf32> to vector<1x2x128xf32>
    tpu.vector_store %arg7[%c0_28, %c0_29, %c0_30], %65 {strides = array<i32>} : memref<1x2x128xf32, #tpu.memory_space<vmem>>, vector<1x2x128xf32>,
    %66 = tpu.iota {dimensions = array<i32: 1>} : vector<2x8x1xi32>
    %67 = vector.broadcast %44 : vector<2x1x1xf32> to vector<2x8x1xf32>
    %68 = arith.cmpf oge, %42, %67 : vector<2x8x1xf32>
    %c4_i32_31 = arith.constant 4 : i32
    %69 = vector.broadcast %c4_i32_31 : i32 to vector<2x8x1xi32>
    %70 = arith.select %68, %66, %69 : vector<2x8x1xi1>, vector<2x8x1xi32>
    %cst_32 = arith.constant dense<2147483647> : vector<2x1xi32>
    %71 = vector.multi_reduction <minsi>, %70, %cst_32 [1] : vector<2x8x1xi32> to vector<2x1xi32>
    %c0_33 = arith.constant 0 : index
    %c0_34 = arith.constant 0 : index
    %c0_35 = arith.constant 0 : index
    %72 = vector.load %arg8[%c0_33, %c0_34, %c0_35] : memref<1x2x1xi32, #tpu.memory_space<vmem>>, vector<1x2x1xi32>
    %73 = vector.shape_cast %72 : vector<1x2x1xi32> to vector<2x1xi32>
    %74 = vector.shape_cast %71 : vector<2x1xi32> to vector<1x2x1xi32>
    tpu.vector_store %arg8[%c0_33, %c0_34, %c0_35], %74 {strides = array<i32>} : memref<1x2x1xi32, #tpu.memory_space<vmem>>, vector<1x2x1xi32>,
    return
  }
  func.func @transform_0(%arg0: i32) -> (i32, i32, i32) {
    %c0_i32 = arith.constant 0 : i32
    %c0_i32_0 = arith.constant 0 : i32
    %c0_i32_1 = arith.constant 0 : i32
    return %arg0, %c0_i32, %c0_i32_0 : i32, i32, i32
  }
  func.func @transform_1(%arg0: i32) -> (i32, i32, i32) {
    %c0_i32 = arith.constant 0 : i32
    %c0_i32_0 = arith.constant 0 : i32
    %c0_i32_1 = arith.constant 0 : i32
    return %arg0, %c0_i32, %c0_i32_0 : i32, i32, i32
  }
  func.func @transform_2(%arg0: i32) -> (i32, i32, i32) {
    %c0_i32 = arith.constant 0 : i32
    %c0_i32_0 = arith.constant 0 : i32
    %c0_i32_1 = arith.constant 0 : i32
    return %arg0, %c0_i32, %c0_i32_0 : i32, i32, i32
  }
  func.func @transform_3(%arg0: i32) -> (i32, i32, i32) {
    %c0_i32 = arith.constant 0 : i32
    %c0_i32_0 = arith.constant 0 : i32
    %c0_i32_1 = arith.constant 0 : i32
    return %arg0, %c0_i32, %c0_i32_0 : i32, i32, i32
  }
  func.func @transform_4(%arg0: i32) -> (i32, i32, i32) {
    %c0_i32 = arith.constant 0 : i32
    %c0_i32_0 = arith.constant 0 : i32
    %c0_i32_1 = arith.constant 0 : i32
    return %arg0, %c0_i32, %c0_i32_0 : i32, i32, i32
  }
  func.func @transform_5(%arg0: i32) -> (i32, i32, i32) {
    %c0_i32 = arith.constant 0 : i32
    %c0_i32_0 = arith.constant 0 : i32
    %c0_i32_1 = arith.constant 0 : i32
    return %arg0, %c0_i32, %c0_i32_0 : i32, i32, i32
  }
  func.func @transform_6(%arg0: i32) -> (i32, i32, i32) {
    %c0_i32 = arith.constant 0 : i32
    %c0_i32_0 = arith.constant 0 : i32
    %c0_i32_1 = arith.constant 0 : i32
    return %arg0, %c0_i32, %c0_i32_0 : i32, i32, i32
  }
  func.func @transform_7(%arg0: i32) -> (i32, i32, i32) {
    %c0_i32 = arith.constant 0 : i32
    %c0_i32_0 = arith.constant 0 : i32
    %c0_i32_1 = arith.constant 0 : i32
    return %arg0, %c0_i32, %c0_i32_0 : i32, i32, i32
  }
}

</mosaic_0001>

<bundles_post_ra>
// kernel: narre_forward.1
= control target key start
LH: loop header
LB: loop body
LE: loop exit
PB: predicated region body
PF: predicated region fallthrough
CT: control target
= control target key end

     0   :  { %s1626_s24 = smov 0   ;;  %s1939_s0 = inlined_call_operand.vmem [shape: bf16[2,256,96], index: 0, kind: input, shape index: {}]   ;;  %s1940_s1 = inlined_call_operand.vmem [shape: bf16[2,16,32], index: 1, kind: input, shape index: {}]   ;;  %s1941_s2 = inlined_call_operand.vmem [shape: bf16[2,96,32], index: 2, kind: input, shape index: {}]   ;;  %s1942_s3 = inlined_call_operand.vmem [shape: bf16[2,64,32], index: 3, kind: input, shape index: {}]   ;;  %s1943_s4 = inlined_call_operand.vmem [shape: bf16[2,32,128], index: 4, kind: input, shape index: {}]   ;;  %s1944_s5 = inlined_call_operand.vmem [shape: f32[2,4,128], index: 5, kind: input, shape index: {}]   ;;  %s1945_s6 = inlined_call_operand.vmem [shape: f32[2,2,128], index: 6, kind: output, shape index: {0}]   ;;  %s1946_s7 = inlined_call_operand.vmem [shape: s32[2,2,1], index: 7, kind: output, shape index: {1}]  }
   0x1 LB: > { %s1355_s25 = sadd.s32 4294967295, %s1583_s24   ;;  %p1359_p0 = scmp.ge.s32.totalorder %s1583_s24, 1  ;;  %s1583_s24 = sphi %s1626_s24, %s18_s24  }
   0x2   : > { %p289_p1 = scmp.lt.s32.totalorder %s1583_s24, 3 }
   0x4   : > { %p290_p2 = pnand %p1359_p0, %p289_p1 }
   0x5   : > { %p348_p3 = scmp.lt.s32.totalorder (!%p290_p2), %s1355_s25, 1  ;;  %s1585_s15 = smov (!%p290_p2), 32  }
   0x6   : > { %293 = sbr.rel (%p290_p2) target bundleno = 738 (0x2e2), region = 44 }
   0xb   : > { %s1948_s25 = smov (!%p348_p3, %s1355_s25), 1  ;;  %vm548_vm0 = vcmask 785408   ;;  %v718_v23 = vlaneseq  ;;  %vm755_vm2 = vcmask 261120   ;;  %vm966_vm3 = vcmask 1041409  }
   0xc   : > { %s1559_s26 = smul.u32 48, %s1948_s25  ;;  %s1508_s30 = sshll.u32 %s1948_s25, 7  ;;  %vm968_vm4 = vcmask 1042434   ;;  %vm970_vm5 = vcmask 1043459   ;;  %vm972_vm6 = vcmask 1044484   ;;  %vm974_vm7 = vcmask 1045509  }
   0xd   : > { %s1644_s10 = scalar_lea.vmem %s1939_s0, %s1508_s30  ;;  %s1509_s11 = sshll.u32 %s1948_s25, 3  ;;  %v1686_v25 = vshrl.u32 %v718_v23, 7  ;;  %vm976_vm8 = vcmask 1046534   ;;  %vm978_vm9 = vcmask 1047559   ;;  %vm1031_vm10 = vcmask 523264  }
   0xe   : > { %s362_s29 = scalar_lea.vmem %s1941_s2, %s1559_s26  ;;  %v1512_v6 = vld [vmem:[%s1644_s10] sm:$0xff]  ;;  %v1519_v7 = vld [vmem:[%s1644_s10 + $0x38] sm:$0xff]  ;;  %v1517_v9 = vld [vmem:[%s1644_s10 + $0x28] sm:$0xff]  ;;  %s357_s14 = scalar_lea.vmem %s1940_s1, %s1509_s11 }
   0xf   : > { %v1533_v0 = vld [vmem:[%s362_s29 + $0x28] sm:$0xff]  ;;  %v1532_v1 = vld [vmem:[%s362_s29 + $0x20] sm:$0xff]  ;;  %v1531_v2 = vld [vmem:[%s362_s29 + $0x18] sm:$0xff]  ;;  %s1369_s16 = sshll.u32 %s1948_s25, 2  ;;  %v1694_v29 = vadd.s32 8, %v1686_v25  ;;  %s1510_s20 = sshll.u32 %s1948_s25, 5 }
  0x10   : > { %599 = vmatpush.bf16.msra.mxu0 %v1533_v0  ;;  %1542 = vmatpush.bf16.msra.mxu2 %v1533_v0  ;;  %v1530_v3 = vld [vmem:[%s362_s29 + $0x10] sm:$0xff]  ;;  %v1529_v4 = vld [vmem:[%s362_s29 + $0x8] sm:$0xff]  ;;  %v1528_v5 = vld [vmem:[%s362_s29] sm:$0xff]  ;;  %s376_s19 = scalar_lea.vmem %s1944_s5, %s1369_s16  ;;  %s1783_s23 = scalar_lea.vmem %s1942_s3, %s1510_s20  ;;  %vm1059_vm11 = vcmp.lt.s32.totalorder %v1686_v25, 4 }
  0x11   : > { %1543 = vmatpush.bf16.msra.mxu3 %v1533_v0  ;;  %1541 = vmatpush.bf16.msra.mxu1 %v1533_v0  ;;  %v1523_v8 = vld [vmem:[%s1644_s10 + $0x58] sm:$0xff]  ;;  %v1513_v10 = vld [vmem:[%s1644_s10 + $0x8] sm:$0xff]  ;;  %v1520_v11 = vld [vmem:[%s1644_s10 + $0x40] sm:$0xff]  ;;  %vm722_vm1 = vcmp.lt.s32.totalorder %v1694_v29, 14  ;;  %s1511_s26 = sshll.u32 %s1948_s25, 4  ;;  %s1370_s30 = sshll.u32 %s1948_s25, 1 }
  0x12   : > { %v1524_v12 = vld [vmem:[%s1644_s10 + $0x60] sm:$0xff]  ;;  %v1518_v13 = vld [vmem:[%s1644_s10 + $0x30] sm:$0xff]  ;;  %v1521_v15 = vld [vmem:[%s1644_s10 + $0x48] sm:$0xff]  ;;  %s372_s29 = scalar_lea.vmem %s1943_s4, %s1511_s26  ;;  %s380_s13 = scalar_lea.vmem %s1945_s6, %s1370_s30 }
  0x13   : > { %v1514_v14 = vld [vmem:[%s1644_s10 + $0x10] sm:$0xff]  ;;  %v1525_v16 = vld [vmem:[%s1644_s10 + $0x68] sm:$0xff]  ;;  %v1534_v17 = vld [vmem:[%s357_s14] sm:$0xff] }
  0x14   : > { %600 = vmatpush.bf16.msra.mxu0 %v1532_v1  ;;  %1545 = vmatpush.bf16.msra.mxu2 %v1532_v1  ;;  %v1515_v18 = vld [vmem:[%s1644_s10 + $0x18] sm:$0xff]  ;;  %v1522_v19 = vld [vmem:[%s1644_s10 + $0x50] sm:$0xff]  ;;  %v1516_v21 = vld [vmem:[%s1644_s10 + $0x20] sm:$0xff] }
  0x15   : > { %1546 = vmatpush.bf16.msra.mxu3 %v1532_v1  ;;  %1544 = vmatpush.bf16.msra.mxu1 %v1532_v1  ;;  %v1526_v20 = vld [vmem:[%s1644_s10 + $0x70] sm:$0xff]  ;;  %v1527_v22 = vld [vmem:[%s1644_s10 + $0x78] sm:$0xff]  ;;  %v1688_v26 = vld [vmem:[%s376_s19] sm:$0xf]  ;;  %s384_s10 = scalar_lea.vmem %s1946_s7, %s1370_s30 }
  0x16   : > { %993 = vrot.lane.b32.xlu0 %v1534_v17, %s1585_s15  ;;  %v1691_v27 = vperm.slane %v1688_v26, 0 }
  0x18   : > { %601 = vmatpush.bf16.msra.mxu0 %v1531_v2  ;;  %1548 = vmatpush.bf16.msra.mxu2 %v1531_v2 }
  0x19   : > { %1549 = vmatpush.bf16.msra.mxu3 %v1531_v2  ;;  %1547 = vmatpush.bf16.msra.mxu1 %v1531_v2 }
  0x1c   : > { %602 = vmatpush.bf16.msra.mxu0 %v1530_v3  ;;  %1551 = vmatpush.bf16.msra.mxu2 %v1530_v3 }
  0x1d   : > { %1552 = vmatpush.bf16.msra.mxu3 %v1530_v3  ;;  %1550 = vmatpush.bf16.msra.mxu1 %v1530_v3 }
  0x20   : > { %603 = vmatpush.bf16.msra.mxu0 %v1529_v4  ;;  %1554 = vmatpush.bf16.msra.mxu2 %v1529_v4 }
  0x21   : > { %1555 = vmatpush.bf16.msra.mxu3 %v1529_v4  ;;  %1553 = vmatpush.bf16.msra.mxu1 %v1529_v4 }
  0x24   : > { %604 = vmatpush.bf16.msra.mxu0 %v1528_v5  ;;  %1557 = vmatpush.bf16.msra.mxu2 %v1528_v5 }
  0x25   : > { %1558 = vmatpush.bf16.msra.mxu3 %v1528_v5  ;;  %1556 = vmatpush.bf16.msra.mxu1 %v1528_v5 }
  0x27   : > { %1460 = vmatmul.msk.bf16.vlgmr.msra.gmra.mxu0 %vm548_vm0, %v1512_v6  ;;  %1467 = vmatmul.msk.bf16.vlgmr.msra.gmra.mxu2 %vm548_vm0, %v1519_v7 }
  0x28   : > { %1471 = vmatmul.msk.bf16.vlgmr.msra.gmra.mxu3 %vm548_vm0, %v1523_v8  ;;  %1465 = vmatmul.msk.bf16.vlgmr.msra.gmra.mxu1 %vm548_vm0, %v1517_v9 }
  0x37   : > { %1461 = vmatmul.msk.bf16.gmra.mxu0 %vm548_vm0, %v1513_v10  ;;  %1468 = vmatmul.msk.bf16.gmra.mxu2 %vm548_vm0, %v1520_v11 }
  0x38   : > { %1472 = vmatmul.msk.bf16.gmra.mxu3 %vm548_vm0, %v1524_v12  ;;  %1466 = vmatmul.msk.bf16.gmra.mxu1 %vm548_vm0, %v1518_v13 }
  0x47   : > { %1462 = vmatmul.msk.bf16.gmra.mxu0 %vm548_vm0, %v1514_v14  ;;  %1469 = vmatmul.msk.bf16.gmra.mxu2 %vm548_vm0, %v1521_v15 }
  0x48   : > { %1473 = vmatmul.msk.bf16.gmra.mxu3 %vm548_vm0, %v1525_v16 }
  0x57   : > { %1463 = vmatmul.msk.bf16.gmra.mxu0 %vm548_vm0, %v1515_v18  ;;  %1470 = vmatmul.msk.bf16.gmra.mxu2 %vm548_vm0, %v1522_v19 }
  0x58   : > { %1474 = vmatmul.msk.bf16.gmra.mxu3 %vm548_vm0, %v1526_v20 }
  0x67   : > { %1464 = vmatmul.msk.bf16.gmra.mxu0 %vm548_vm0, %v1516_v21 }
  0x68   : > { %1475 = vmatmul.msk.bf16.gmra.mxu3 %vm548_vm0, %v1527_v22 }
  0xa4   : > { %v606_v24 = vpop.f32.mrf.mxu0 }
  0xa5   : > { %v607_v33 = vadd.f32 %v606_v24, %v1691_v27  ;;  %v631_v36 = vpop.f32.mrf.mxu1 }
  0xa6   : > { %v632_v2 = vadd.f32 %v631_v36, %v1691_v27 }
  0xa7   : > { %v686_v37 = vmax.f32 %v607_v33, 0.0 }
  0xa8   : > { %v696_v21 = vmax.f32 %v632_v2, 0.0 }
  0xa9   : > { %v756_v42 = vsel %vm755_vm2, %v686_v37, -inf }
  0xaa   : > { %v641_v28 = vpop.f32.mrf.mxu2  ;;  %v801_v37 = vsel %vm755_vm2, %v696_v21, -inf }
  0xab   : > { %v661_v30 = vpop.f32.mrf.mxu3  ;;  %v642_v51 = vadd.f32 %v641_v28, %v1691_v27 }
  0xac   : > { %v608_v31 = vpop.f32.mrf.mxu0  ;;  %v662_v52 = vadd.f32 %v661_v30, %v1691_v27 }
  0xad   : > { %v609_v32 = vadd.f32 %v608_v31, %v1691_v27  ;;  %v633_v50 = vpop.f32.mrf.mxu1  ;;  %v700_v61 = vmax.f32 %v642_v51, 0.0 }
  0xae   : > { %v634_v58 = vadd.f32 %v633_v50, %v1691_v27  ;;  %v708_v62 = vmax.f32 %v662_v52, 0.0 }
  0xaf   : > { %v687_v34 = vmax.f32 %v609_v32, 0.0  ;;  %v819_v12 = vsel %vm755_vm2, %v700_v61, -inf }
  0xb0   : > { %v697_v7 = vmax.f32 %v634_v58, 0.0  ;;  %v855_v20 = vsel %vm755_vm2, %v708_v62, -inf }
  0xb1   : > { %v724_v35 = vsel %vm722_vm1, %v687_v34, 0.0 }
  0xb2   : > { %v643_v38 = vpop.f32.mrf.mxu2  ;;  %v757_v40 = vsel %vm755_vm2, %v724_v35, -inf  ;;  %v734_v22 = vsel %vm722_vm1, %v697_v7, 0.0 }
  0xb3   : > { %v663_v39 = vpop.f32.mrf.mxu3  ;;  %v758_v43 = vmax.f32 %v756_v42, %v757_v40  ;;  %v644_v44 = vadd.f32 %v643_v38, %v1691_v27 }
  0xb4   : > { %v611_v41 = vpop.f32.mrf.mxu0  ;;  %v664_v45 = vadd.f32 %v663_v39, %v1691_v27  ;;  %v802_v39 = vsel %vm755_vm2, %v734_v22, -inf }
  0xb5   : > { %v612_v46 = vadd.f32 %v611_v41, %v1691_v27  ;;  %v759_v48 = vrot.slane %v758_v43, 4  ;;  %v701_v54 = vmax.f32 %v644_v44, 0.0  ;;  %v636_v19 = vpop.f32.mrf.mxu1  ;;  %v803_v52 = vmax.f32 %v801_v37, %v802_v39 }
  0xb6   : > { %v709_v56 = vmax.f32 %v664_v45, 0.0 }
  0xb7   : > { %v688_v57 = vmax.f32 %v612_v46, 0.0  ;;  %v760_v59 = vmax.f32 %v758_v43, %v759_v48  ;;  %v738_v63 = vsel %vm722_vm1, %v701_v54, 0.0 }
  0xb8   : > { %v746_v3 = vsel %vm722_vm1, %v709_v56, 0.0  ;;  %v820_v13 = vsel %vm755_vm2, %v738_v63, -inf }
  0xb9   : > { %v765_v4 = vsel %vm755_vm2, %v688_v57, -inf  ;;  %v761_v8 = vrot.slane %v760_v59, 2  ;;  %v856_v15 = vsel %vm755_vm2, %v746_v3, -inf  ;;  %v821_v24 = vmax.f32 %v819_v12, %v820_v13 }
  0xba   : > { %v646_v47 = vpop.f32.mrf.mxu2  ;;  %v857_v31 = vmax.f32 %v855_v20, %v856_v15 }
  0xbb   : > { %v666_v49 = vpop.f32.mrf.mxu3  ;;  %v647_v0 = vadd.f32 %v646_v47, %v1691_v27  ;;  %v762_v23 = vmax.f32 %v760_v59, %v761_v8  ;;  %v822_v41 = vrot.slane %v821_v24, 4 }
  0xbc   : > { %v613_v53 = vpop.f32.mrf.mxu0  ;;  %v858_v44 = vrot.slane %v857_v31, 4  ;;  %v667_v45 = vadd.f32 %v666_v49, %v1691_v27 }
  0xbd   : > { %v614_v55 = vadd.f32 %v613_v53, %v1691_v27  ;;  %v702_v16 = vmax.f32 %v647_v0, 0.0  ;;  %v763_v40 = vrot.slane %v762_v23, 1  ;;  %v823_v56 = vmax.f32 %v821_v24, %v822_v41  ;;  %v638_v59 = vpop.f32.mrf.mxu1 }
  0xbe   : > { %v710_v49 = vmax.f32 %v667_v45, 0.0 }
  0xbf   : > { %v689_v60 = vmax.f32 %v614_v55, 0.0  ;;  %v828_v32 = vsel %vm755_vm2, %v702_v16, -inf  ;;  %v1738_v55 = vmax.f32 %v762_v23, %v763_v40  ;;  %v824_v7 = vrot.slane %v823_v56, 2 }
  0xc1   : > { %v726_v1 = vsel %vm722_vm1, %v689_v60, 0.0  ;;  %v859_v60 = vmax.f32 %v857_v31, %v858_v44  ;;  %v900_v37 = vpack.c.bf16 %v1738_v55, %v1738_v55  ;;  %v1768_v40 = vmax.f32 %v823_v56, %v824_v7 }
  0xc2   : > { %v766_v5 = vsel %vm755_vm2, %v726_v1, -inf  ;;  %v648_v6 = vpop.f32.mrf.mxu2  ;;  %v804_v1 = vrot.slane %v803_v52, 4 }
  0xc3   : > { %v767_v9 = vmax.f32 %v765_v4, %v766_v5  ;;  %v649_v10 = vadd.f32 %v648_v6, %v1691_v27  ;;  %v668_v11 = vpop.f32.mrf.mxu3  ;;  %v639_v6 = vadd.f32 %v638_v59, %v1691_v27 }
  0xc4   : > { %v616_v14 = vpop.f32.mrf.mxu0  ;;  %v669_v35 = vadd.f32 %v668_v11, %v1691_v27  ;;  %v637_v11 = vadd.f32 %v636_v19, %v1691_v27  ;;  %v805_v23 = vmax.f32 %v803_v52, %v804_v1 }
  0xc5   : > { %v768_v17 = vrot.slane %v767_v9, 4  ;;  %v703_v18 = vmax.f32 %v649_v10, 0.0  ;;  %v617_v36 = vadd.f32 %v616_v14, %v1691_v27 }
  0xc6   : > { %v711_v50 = vmax.f32 %v669_v35, 0.0 }
  0xc7   : > { %v769_v28 = vmax.f32 %v767_v9, %v768_v17  ;;  %v740_v30 = vsel %vm722_vm1, %v703_v18, 0.0  ;;  %v690_v53 = vmax.f32 %v617_v36, 0.0  ;;  %v860_v17 = vrot.slane %v859_v60, 2 }
  0xc8   : > { %v829_v34 = vsel %vm755_vm2, %v740_v30, -inf  ;;  %v748_v63 = vsel %vm722_vm1, %v711_v50, 0.0  ;;  %v864_v18 = vsel %vm755_vm2, %v710_v49, -inf }
  0xc9   : > { %v770_v33 = vrot.slane %v769_v28, 2  ;;  %v830_v46 = vmax.f32 %v828_v32, %v829_v34  ;;  %v774_v2 = vsel %vm755_vm2, %v690_v53, -inf  ;;  %v865_v13 = vsel %vm755_vm2, %v748_v63, -inf }
  0xca   : > { %v651_v38 = vpop.f32.mrf.mxu2  ;;  %v866_v30 = vmax.f32 %v864_v18, %v865_v13  ;;  %v698_v32 = vmax.f32 %v637_v11, 0.0  ;;  %v861_v41 = vmax.f32 %v859_v60, %v860_v17  ;;  %v1538_v13 = vld [vmem:[%s1783_s23 + $0x18] sm:$0xff] }
  0xcb   : > { %v771_v42 = vmax.f32 %v769_v28, %v770_v33  ;;  %v671_v43 = vpop.f32.mrf.mxu3  ;;  %v652_v54 = vadd.f32 %v651_v38, %v1691_v27  ;;  %v831_v61 = vrot.slane %v830_v46, 4  ;;  %v699_v28 = vmax.f32 %v639_v6, 0.0  ;;  %1038 = vmatpush.bf16.msrb.mxu1 %v1538_v13 }
  0xcc   : > { %v618_v47 = vpop.f32.mrf.mxu0  ;;  %v672_v14 = vadd.f32 %v671_v43, %v1691_v27  ;;  %v867_v52 = vrot.slane %v866_v30, 4  ;;  %v862_v1 = vrot.slane %v861_v41, 1 }
  0xcd   : > { %v772_v48 = vrot.slane %v771_v42, 1  ;;  %v619_v51 = vadd.f32 %v618_v47, %v1691_v27  ;;  %v704_v3 = vmax.f32 %v652_v54, 0.0  ;;  %v832_v12 = vmax.f32 %v830_v46, %v831_v61 }
  0xce   : > { %v712_v34 = vmax.f32 %v672_v14, 0.0  ;;  %v736_v44 = vsel %vm722_vm1, %v699_v28, 0.0  ;;  %v806_v46 = vrot.slane %v805_v23, 2  ;;  %v810_v54 = vsel %vm755_vm2, %v698_v32, -inf }
  0xcf   : > { %v1740_v57 = vmax.f32 %v771_v42, %v772_v48  ;;  %v691_v58 = vmax.f32 %v619_v51, 0.0  ;;  %v837_v22 = vsel %vm755_vm2, %v704_v3, -inf  ;;  %v833_v33 = vrot.slane %v832_v12, 2 }
  0xd0   : > { %v873_v53 = vsel %vm755_vm2, %v712_v34, -inf  ;;  %v811_v49 = vsel %vm755_vm2, %v736_v44, -inf  ;;  %v868_v6 = vmax.f32 %v866_v30, %v867_v52  ;;  %v807_v7 = vmax.f32 %v805_v23, %v806_v46 }
  0xd1   : > { %v1745_v62 = vsel %vm966_vm3, %v1740_v57, %v1738_v55  ;;  %v728_v0 = vsel %vm722_vm1, %v691_v58, 0.0  ;;  %v834_v51 = vmax.f32 %v832_v12, %v833_v33  ;;  %v901_v55 = vpack.c.bf16 %v1740_v57, %v1740_v57 }
  0xd2   : > { %v775_v4 = vsel %vm755_vm2, %v728_v0, -inf  ;;  %v653_v5 = vpop.f32.mrf.mxu2  ;;  %v869_v28 = vrot.slane %v868_v6, 2 }
  0xd3   : > { %v776_v8 = vmax.f32 %v774_v2, %v775_v4  ;;  %v654_v9 = vadd.f32 %v653_v5, %v1691_v27  ;;  %v673_v10 = vpop.f32.mrf.mxu3  ;;  %v835_v5 = vrot.slane %v834_v51, 1  ;;  %v1842_v57 = vperm.slane %v901_v55, 0 }
  0xd4   : > { %v674_v15 = vadd.f32 %v673_v10, %v1691_v27  ;;  %v621_v16 = vpop.f32.mrf.mxu0 }
  0xd5   : > { %v777_v20 = vrot.slane %v776_v8, 4  ;;  %v705_v21 = vmax.f32 %v654_v9, 0.0  ;;  %v622_v42 = vadd.f32 %v621_v16, %v1691_v27 }
  0xd6   : > { %v713_v24 = vmax.f32 %v674_v15, 0.0 }
  0xd7   : > { %v778_v19 = vmax.f32 %v776_v8, %v777_v20  ;;  %v742_v31 = vsel %vm722_vm1, %v705_v21, 0.0  ;;  %v692_v63 = vmax.f32 %v622_v42, 0.0  ;;  %v812_v8 = vmax.f32 %v810_v54, %v811_v49 }
  0xd8   : > { %v838_v35 = vsel %vm755_vm2, %v742_v31, -inf  ;;  %v750_v36 = vsel %vm722_vm1, %v713_v24, 0.0  ;;  %v1798_v20 = vmax.f32 %v861_v41, %v862_v1  ;;  %v1801_v24 = vmax.f32 %v834_v51, %v835_v5  ;;  %v1535_v5 = vld [vmem:[%s1783_s23] sm:$0xff] }
  0xd9   : > { %v779_v38 = vrot.slane %v778_v19, 2  ;;  %v839_v39 = vmax.f32 %v837_v22, %v838_v35  ;;  %v874_v48 = vsel %vm755_vm2, %v750_v36, -inf  ;;  %v783_v15 = vsel %vm755_vm2, %v692_v63, -inf  ;;  %v1537_v36 = vld [vmem:[%s1783_s23 + $0x10] sm:$0xff] }
  0xda   : > { %v656_v43 = vpop.f32.mrf.mxu2  ;;  %v875_v61 = vmax.f32 %v873_v53, %v874_v48  ;;  %v813_v30 = vrot.slane %v812_v8, 4  ;;  %1039 = vmatpush.bf16.msrb.mxu1 %v1537_v36  ;;  %v870_v48 = vmax.f32 %v868_v6, %v869_v28  ;;  %v826_v63 = vrot.slane %v1768_v40, 1 }
  0xdb   : > { %v780_v45 = vmax.f32 %v778_v19, %v779_v38  ;;  %v840_v47 = vrot.slane %v839_v39, 4  ;;  %v676_v50 = vpop.f32.mrf.mxu3  ;;  %v657_v0 = vadd.f32 %v656_v43, %v1691_v27  ;;  %v808_v38 = vrot.slane %v807_v7, 1 }
  0xdc   : > { %v623_v56 = vpop.f32.mrf.mxu0  ;;  %v677_v11 = vadd.f32 %v676_v50, %v1691_v27  ;;  %v876_v14 = vrot.slane %v875_v61, 4  ;;  %v911_v43 = vpack.c.bf16 %v1798_v20, %v1798_v20  ;;  %v814_v50 = vmax.f32 %v812_v8, %v813_v30 }
  0xdd   : > { %v781_v58 = vrot.slane %v780_v45, 1  ;;  %v841_v59 = vmax.f32 %v839_v39, %v840_v47  ;;  %v624_v60 = vadd.f32 %v623_v56, %v1691_v27  ;;  %v706_v16 = vmax.f32 %v657_v0, 0.0  ;;  %v1536_v47 = vld [vmem:[%s1783_s23 + $0x8] sm:$0xff] }
  0xde   : > { %v714_v33 = vmax.f32 %v677_v11, 0.0  ;;  %v877_v39 = vmax.f32 %v875_v61, %v876_v14  ;;  %v1830_v0 = vmax.f32 %v807_v7, %v808_v38  ;;  %1040 = vmatpush.bf16.msrb.mxu1 %v1536_v47  ;;  %v1833_v6 = vperm.slane %v911_v43, 0 }
  0xdf   : > { %v1785_v2 = vmax.f32 %v780_v45, %v781_v58  ;;  %v842_v3 = vrot.slane %v841_v59, 2  ;;  %v693_v4 = vmax.f32 %v624_v60, 0.0  ;;  %v846_v41 = vsel %vm755_vm2, %v706_v16, -inf }
  0xe0   : > { %v882_v53 = vsel %vm755_vm2, %v714_v33, -inf  ;;  %v878_v60 = vrot.slane %v877_v39, 2  ;;  %v871_v11 = vrot.slane %v870_v48, 1 }
  0xe1   : > { %v1790_v9 = vsel %vm968_vm4, %v1785_v2, %v1745_v62  ;;  %v843_v10 = vmax.f32 %v841_v59, %v842_v3  ;;  %v730_v12 = vsel %vm722_vm1, %v693_v4, 0.0  ;;  %v1826_v59 = vperm.slane %v900_v37, 0 }
  0xe2   : > { %v784_v17 = vsel %vm755_vm2, %v730_v12, -inf  ;;  %v658_v18 = vpop.f32.mrf.mxu2  ;;  %v815_v37 = vrot.slane %v814_v50, 2  ;;  %v879_v7 = vmax.f32 %v877_v39, %v878_v60  ;;  %1041 = vmatpush.bf16.msrb.mxu1 %v1535_v5  ;;  %v872_v30 = vmax.f32 %v870_v48, %v871_v11 }
  0xe3   : > { %v844_v21 = vrot.slane %v843_v10, 1  ;;  %v785_v62 = vmax.f32 %v783_v15, %v784_v17  ;;  %v659_v22 = vadd.f32 %v658_v18, %v1691_v27  ;;  %v678_v23 = vpop.f32.mrf.mxu3  ;;  %v905_v17 = vpack.c.bf16 %v1830_v0, %v1830_v0 }
  0xe4   : > { %v679_v19 = vadd.f32 %v678_v23, %v1691_v27  ;;  %v626_v31 = vpop.f32.mrf.mxu0  ;;  %v908_v39 = vpack.c.bf16 %v1801_v24, %v1801_v24  ;;  %v950_v29 = vunpack.c.l.b16 %v1826_v59 }
  0xe5   : > { %v1804_v32 = vmax.f32 %v843_v10, %v844_v21  ;;  %v786_v34 = vrot.slane %v785_v62, 4  ;;  %v707_v35 = vmax.f32 %v659_v22, 0.0  ;;  %v627_v61 = vadd.f32 %v626_v31, %v1691_v27 }
  0xe6   : > { %v715_v42 = vmax.f32 %v679_v19, 0.0  ;;  %v816_v22 = vmax.f32 %v814_v50, %v815_v37  ;;  %v942_v5 = vperm.slane %v908_v39, 0 }
  0xe7   : > { %v1813_v44 = vsel %vm966_vm3, %v1804_v32, %v1801_v24  ;;  %v787_v45 = vmax.f32 %v785_v62, %v786_v34  ;;  %v744_v46 = vsel %vm722_vm1, %v707_v35, 0.0  ;;  %v694_v16 = vmax.f32 %v627_v61, 0.0 }
  0xe8   : > { %v847_v51 = vsel %vm755_vm2, %v744_v46, -inf  ;;  %v752_v52 = vsel %vm722_vm1, %v715_v42, 0.0  ;;  %v880_v34 = vrot.slane %v879_v7, 1 }
  0xe9   : > { %v788_v54 = vrot.slane %v787_v45, 2  ;;  %v848_v56 = vmax.f32 %v846_v41, %v847_v51  ;;  %v883_v58 = vsel %vm755_vm2, %v752_v52, -inf  ;;  %v792_v36 = vsel %vm755_vm2, %v694_v16, -inf }
  0xea   : > { %v884_v49 = vmax.f32 %v882_v53, %v883_v58  ;;  %v909_v41 = vpack.c.bf16 %v1804_v32, %v1804_v32  ;;  %v902_v52 = vpack.c.bf16 %v1785_v2, %v1785_v2  ;;  %v881_v53 = vmax.f32 %v879_v7, %v880_v34 }
  0xeb   : > { %v789_v1 = vmax.f32 %v787_v45, %v788_v54  ;;  %v849_v3 = vrot.slane %v848_v56, 4  ;;  %v681_v4 = vpop.f32.mrf.mxu3  ;;  %v817_v45 = vrot.slane %v816_v22, 1  ;;  %v961_v7 = vunpack.c.l.b16 %v1833_v6 }
  0xec   : > { %v885_v8 = vrot.slane %v884_v49, 4  ;;  %v628_v10 = vpop.f32.mrf.mxu0  ;;  %v682_v28 = vadd.f32 %v681_v4, %v1691_v27  ;;  %v943_v54 = vperm.slane %v909_v41, 0  ;;  %v913_v34 = vpack.c.bf16 %v881_v53, %v881_v53 }
  0xed   : > { %v790_v12 = vrot.slane %v789_v1, 1  ;;  %v850_v13 = vmax.f32 %v848_v56, %v849_v3  ;;  %v629_v14 = vadd.f32 %v628_v10, %v1691_v27 }
  0xee   : > { %v886_v15 = vmax.f32 %v884_v49, %v885_v8  ;;  %v716_v47 = vmax.f32 %v682_v28, 0.0  ;;  %v818_v8 = vmax.f32 %v816_v22, %v817_v45  ;;  %v951_v28 = vunpack.c.l.b16 %v1842_v57 }
  0xef   : > { %v1840_v18 = vmax.f32 %v789_v1, %v790_v12  ;;  %v851_v21 = vrot.slane %v850_v13, 2  ;;  %v695_v62 = vmax.f32 %v629_v14, 0.0  ;;  %v827_v12 = vmax.f32 %v1768_v40, %v826_v63 }
  0xf0   : > { %v887_v23 = vrot.slane %v886_v15, 2  ;;  %v891_v49 = vsel %vm755_vm2, %v716_v47, -inf  ;;  %v967_v41 = vsel %vm966_vm3, %v951_v28, %v950_v29  ;;  %v947_v45 = vperm.slane %v913_v34, 0 }
  0xf1   : > { %v1848_v19 = vsel %vm970_vm5, %v1840_v18, %v1790_v9  ;;  %v852_v31 = vmax.f32 %v850_v13, %v851_v21  ;;  %v732_v33 = vsel %vm722_vm1, %v695_v62, 0.0  ;;  %v959_v13 = vunpack.c.l.b16 %v943_v54 }
  0xf2   : > { %v888_v35 = vmax.f32 %v886_v15, %v887_v23  ;;  %v793_v38 = vsel %vm755_vm2, %v732_v33, -inf  ;;  %v936_v15 = vperm.slane %v902_v52, 0  ;;  %v958_v21 = vunpack.c.l.b16 %v942_v5 }
  0xf3   : > { %v853_v42 = vrot.slane %v852_v31, 1  ;;  %v794_v43 = vmax.f32 %v792_v36, %v793_v38  ;;  %v683_v9 = vpop.f32.mrf.mxu3  ;;  %v939_v62 = vperm.slane %v905_v17, 0  ;;  %v907_v39 = vpack.c.bf16 %v827_v12, %v827_v12 }
  0xf4   : > { %v889_v46 = vrot.slane %v888_v35, 1  ;;  %v684_v48 = vadd.f32 %v683_v9, %v1691_v27  ;;  %v980_v33 = vsel %vm966_vm3, %v959_v13, %v958_v21  ;;  %v952_v63 = vunpack.c.l.b16 %v936_v15 }
  0xf5   : > { %v854_v50 = vmax.f32 %v852_v31, %v853_v42  ;;  %v795_v51 = vrot.slane %v794_v43, 4  ;;  %v906_v31 = vpack.c.bf16 %v818_v8, %v818_v8 }
  0xf6   : > { %v717_v24 = vmax.f32 %v684_v48, 0.0  ;;  %v890_v27 = vmax.f32 %v888_v35, %v889_v46  ;;  %v969_v52 = vsel %vm968_vm4, %v952_v63, %v967_v41 }
  0xf7   : > { %v910_v32 = vpack.c.bf16 %v854_v50, %v854_v50  ;;  %v1120_v56 = vsel %vm968_vm4, %v854_v50, %v1813_v44  ;;  %v796_v58 = vmax.f32 %v794_v43, %v795_v51  ;;  %v903_v44 = vpack.c.bf16 %v1840_v18, %v1840_v18 }
  0xf8   : > { %v1121_v60 = vsel %vm970_vm5, %v1798_v20, %v1120_v56  ;;  %v754_v61 = vsel %vm722_vm1, %v717_v24, 0.0  ;;  %v912_v20 = vpack.c.bf16 %v872_v30, %v872_v30  ;;  %v914_v42 = vpack.c.bf16 %v890_v27, %v890_v27 }
  0xf9   : > { %v944_v1 = vperm.slane %v910_v32, 0  ;;  %v797_v2 = vrot.slane %v796_v58, 2  ;;  %v892_v3 = vsel %vm755_vm2, %v754_v61, -inf  ;;  %v1122_v4 = vsel %vm972_vm6, %v872_v30, %v1121_v60 }
  0xfa   : > { %v893_v55 = vmax.f32 %v891_v49, %v892_v3  ;;  %v1123_v37 = vsel %vm974_vm7, %v881_v53, %v1122_v4  ;;  %v937_v23 = vperm.slane %v903_v44, 0  ;;  %v946_v30 = vperm.slane %v912_v20, 0  ;;  %v994_v20 = vpop.permute.xlu0 %993 }
  0xfb   : > { %v798_v10 = vmax.f32 %v796_v58, %v797_v2  ;;  %v1124_v11 = vsel %vm976_vm8, %v890_v27, %v1123_v37  ;;  %v960_v16 = vunpack.c.l.b16 %v944_v1  ;;  %v940_v50 = vperm.slane %v906_v31, 0 }
  0xfc   : > { %v894_v14 = vrot.slane %v893_v55, 4  ;;  %v953_v17 = vunpack.c.l.b16 %v937_v23  ;;  %v962_v48 = vunpack.c.l.b16 %v946_v30  ;;  %v955_v53 = vunpack.c.l.b16 %v939_v62 }
  0xfd   : > { %v799_v18 = vrot.slane %v798_v10, 1  ;;  %v981_v36 = vsel %vm968_vm4, %v960_v16, %v980_v33  ;;  %v948_v54 = vperm.slane %v914_v42, 0  ;;  %v941_v32 = vperm.slane %v907_v39, 0 }
  0xfe   : > { %v895_v22 = vmax.f32 %v893_v55, %v894_v14  ;;  %v982_v47 = vsel %vm970_vm5, %v961_v7, %v981_v36  ;;  %v971_v24 = vsel %vm970_vm5, %v953_v17, %v969_v52  ;;  %v963_v60 = vunpack.c.l.b16 %v947_v45  ;;  %v1539_v52 = vld [vmem:[%s372_s29] sm:$0xff] }
  0xff   : > { %v800_v59 = vmax.f32 %v798_v10, %v799_v18  ;;  %v983_v58 = vsel %vm972_vm6, %v962_v48, %v982_v47  ;;  %v956_v1 = vunpack.c.l.b16 %v940_v50  ;;  %v964_v4 = vunpack.c.l.b16 %v948_v54  ;;  %v1540_v50 = vld [vmem:[%s372_s29 + $0x8] sm:$0xff] }
 0x100   : > { %v896_v40 = vrot.slane %v895_v22, 2  ;;  %v984_v3 = vsel %vm974_vm7, %v963_v60, %v983_v58  ;;  %v957_v44 = vunpack.c.l.b16 %v941_v32  ;;  %v1050_v7 = vperm.slane %v1688_v26, 3  ;;  %1178 = vmatpush.bf16.msrb.mxu2 %v1540_v50 }
 0x101   : > { %v904_v35 = vpack.c.bf16 %v800_v59, %v800_v59  ;;  %v1115_v6 = vsel %vm972_vm6, %v800_v59, %v1848_v19  ;;  %v985_v37 = vsel %vm976_vm8, %v964_v4, %v984_v3 }
 0x102   : > { %v897_v38 = vmax.f32 %v895_v22, %v896_v40  ;;  %v1116_v57 = vsel %vm974_vm7, %v1830_v0, %v1115_v6 }
 0x103   : > { %v938_v43 = vperm.slane %v904_v35, 0  ;;  %v1117_v9 = vsel %vm976_vm8, %v818_v8, %v1116_v57 }
 0x104   : > { %v898_v46 = vrot.slane %v897_v38, 1  ;;  %v1890_v19 = vsel %vm978_vm9, %v827_v12, %v1117_v9  ;;  %v1006_v12 = vperm.slane %v1688_v26, 1  ;;  %1179 = vmatpush.bf16.msrb.mxu2 %v1539_v52 }
 0x105   : > { %v954_v51 = vunpack.c.l.b16 %v938_v43 }
 0x106   : > { %v899_v0 = vmax.f32 %v897_v38, %v898_v46 }
 0x107   : > { %v973_v56 = vsel %vm972_vm6, %v954_v51, %v971_v24  ;;  %vm1209_vm6 = vcmask 1024  }
 0x108   : > { %v915_v27 = vpack.c.bf16 %v899_v0, %v899_v0  ;;  %v975_v49 = vsel %vm974_vm7, %v955_v53, %v973_v56  ;;  %v1898_v61 = vsel %vm978_vm9, %v899_v0, %v1124_v11 }
 0x109   : > { %v977_v5 = vsel %vm976_vm8, %v956_v1, %v975_v49 }
 0x10a   : > { %v949_v2 = vperm.slane %v915_v27, 0  ;;  %v979_v8 = vsel %vm978_vm9, %v957_v44, %v977_v5 }
 0x10c   : > { %v965_v55 = vunpack.c.l.b16 %v949_v2 }
 0x10e   : > { %v986_v10 = vsel %vm978_vm9, %v965_v55, %v985_v37 }
 0x10f   : > { %v987_v29 = vpack.c.b16 %v986_v10, %v979_v8 }
 0x111   : > { %v997_v11 = vsel %vm755_vm2, %v987_v29, %v994_v20 }
 0x112   : > { %1496 = vmatmul.msk.bf16.vlgmr.msrb.gmra.mxu1 %vm1031_vm10, %v997_v11 }
 0x18f   : > { %v1043_v13 = vpop.f32.mrf.mxu1 }
 0x190   : > { %v1044_v14 = vadd.f32 %v1043_v13, %v1006_v12 }
 0x192   : > { %v1048_v15 = vmax.f32 %v1044_v14, 0.0 }
 0x194   : > { %v1051_v16 = vmul.f32 %v1050_v7, %v1048_v15 }
 0x196   : > { %v1053_v18 = vsel %vm755_vm2, %v1051_v16, 0.0 }
 0x197   : > { %v1045_v21 = vpop.f32.mrf.mxu1  ;;  %1054 = vadd.xlane.f32.xlu0 %v1053_v18 }
 0x198   : > { %v1046_v62 = vadd.f32 %v1045_v21, %v1006_v12 }
 0x19a   : > { %v1049_v23 = vmax.f32 %v1046_v62, 0.0 }
 0x19c   : > { %v1052_v22 = vmul.f32 %v1050_v7, %v1049_v23 }
 0x19e   : > { %v1056_v28 = vsel %vm755_vm2, %v1052_v22, 0.0 }
 0x19f   : > { %1057 = vadd.xlane.f32.xlu1 %v1056_v28 }
 0x20a   : > { %v1055_v30 = vpop.xlane.xlu0 %1054 }
 0x20b   : > { %v1060_v31 = vsel %vm1059_vm11, %v1055_v30, -1e+30 }
 0x20c   : > { %v1062_v59 = vrot.slane %v1060_v31, 4 }
 0x20e   : > { %v1063_v33 = vmax.f32 %v1060_v31, %v1062_v59 }
 0x210   : > { %v1064_v34 = vrot.slane %v1063_v33, 2 }
 0x212   : > { %v1065_v40 = vmax.f32 %v1063_v33, %v1064_v34  ;;  %v1058_v63 = vpop.xlane.xlu1 %1057 }
 0x213   : > { %v1061_v35 = vsel %vm1059_vm11, %v1058_v63, -1e+30 }
 0x214   : > { %v1066_v6 = vrot.slane %v1065_v40, 1  ;;  %v1068_v36 = vrot.slane %v1061_v35, 4 }
 0x216   : > { %v1067_v17 = vmax.f32 %v1065_v40, %v1066_v6  ;;  %v1069_v38 = vmax.f32 %v1061_v35, %v1068_v36 }
 0x218   : > { %v1074_v39 = vsub.f32 %v1060_v31, %v1067_v17  ;;  %vm1186_vm12 = vcmp.ge.f32.partialorder %v1060_v31, %v1067_v17  ;;  %v1070_v57 = vrot.slane %v1069_v38, 2 }
 0x219   : > { %v1188_v41 = vsel %vm1186_vm12, %v1686_v25, 4 }
 0x21a   : > { %v1076_v42 = vmul.f32 1.442695, %v1074_v39  ;;  %v1190_v43 = vrot.slane %v1188_v41, 4  ;;  %v1071_v9 = vmax.f32 %v1069_v38, %v1070_v57 }
 0x21c   : > { %1569 = vpow2.f32 %v1076_v42  ;;  %vm1191_vm13 = vcmp.lt.s32.totalorder %v1188_v41, %v1190_v43  ;;  %v1072_v45 = vrot.slane %v1071_v9, 1 }
 0x21d   : > { %v1192_v46 = vsel %vm1191_vm13, %v1188_v41, %v1190_v43 }
 0x21e   : > { %v1193_v47 = vrot.slane %v1192_v46, 2  ;;  %v1073_v48 = vmax.f32 %v1071_v9, %v1072_v45 }
 0x220   : > { %vm1194_vm14 = vcmp.lt.s32.totalorder %v1192_v46, %v1193_v47  ;;  %v1075_v51 = vsub.f32 %v1061_v35, %v1073_v48  ;;  %vm1187_vm15 = vcmp.ge.f32.partialorder %v1061_v35, %v1073_v48 }
 0x221   : > { %v1189_v53 = vsel %vm1187_vm15, %v1686_v25, 4  ;;  %v1195_v24 = vsel %vm1194_vm14, %v1192_v46, %v1193_v47 }
 0x222   : > { %v1570_v0 = vpop.eup %1569  ;;  %v1078_v54 = vmul.f32 1.442695, %v1075_v51  ;;  %v1199_v32 = vrot.slane %v1189_v53, 4  ;;  %v1196_v60 = vrot.slane %v1195_v24, 1 }
 0x223   : > { %v1080_v56 = vrot.slane %v1570_v0, 4 }
 0x224   : > { %1571 = vpow2.f32 %v1078_v54  ;;  %vm1200_vm0 = vcmp.lt.s32.totalorder %v1189_v53, %v1199_v32  ;;  %vm1197_vm4 = vcmp.lt.s32.totalorder %v1195_v24, %v1196_v60 }
 0x225   : > { %v1081_v58 = vadd.f32 %v1570_v0, %v1080_v56  ;;  %v1201_v27 = vsel %vm1200_vm0, %v1189_v53, %v1199_v32  ;;  %v1198_v55 = vsel %vm1197_vm4, %v1195_v24, %v1196_v60 }
 0x226   : > { %v1202_v49 = vrot.slane %v1201_v27, 2 }
 0x227   : > { %v1082_v1 = vrot.slane %v1081_v58, 2 }
 0x228   : > { %vm1203_vm1 = vcmp.lt.s32.totalorder %v1201_v27, %v1202_v49 }
 0x229   : > { %v1083_v2 = vadd.f32 %v1082_v1, %v1081_v58  ;;  %v1204_v3 = vsel %vm1203_vm1, %v1201_v27, %v1202_v49 }
 0x22a   : > { %v1572_v25 = vpop.eup %1571  ;;  %v1205_v4 = vrot.slane %v1204_v3, 1 }
 0x22b   : > { %v1084_v5 = vrot.slane %v1083_v2, 1  ;;  %v1086_v44 = vrot.slane %v1572_v25, 4 }
 0x22c   : > { %vm1206_vm5 = vcmp.lt.s32.totalorder %v1204_v3, %v1205_v4 }
 0x22d   : > { %v1085_v37 = vadd.f32 %v1084_v5, %v1083_v2  ;;  %v1087_v20 = vadd.f32 %v1572_v25, %v1086_v44  ;;  %v1207_v8 = vsel %vm1206_vm5, %v1204_v3, %v1205_v4 }
 0x22e   : > { %v1208_v10 = vsel %vm966_vm3, %v1207_v8, %v1198_v55 }
 0x22f   : > { %1573 = vrcp.f32 %v1085_v37  ;;  %v1088_v29 = vrot.slane %v1087_v20, 2  ;;  %1210 = vst.msk [vmem:[%s384_s10] sm:$0x3] %vm1209_vm6, %v1208_v10 }
 0x231   : > { %v1089_v11 = vadd.f32 %v1088_v29, %v1087_v20 }
 0x233   : > { %v1090_v12 = vrot.slane %v1089_v11, 1 }
 0x235   : > { %v1574_v13 = vpop.eup %1573  ;;  %v1091_v14 = vadd.f32 %v1090_v12, %v1089_v11 }
 0x236   : > { %v1094_v7 = vmul.f32 %v1574_v13, %v1570_v0 }
 0x237   : > { %1575 = vrcp.f32 %v1091_v14 }
 0x238   : > { %v1128_v15 = vmul.f32 %v1890_v19, %v1094_v7 }
 0x23a   : > { %v1130_v16 = vsel %vm755_vm2, %v1128_v15, 0.0 }
 0x23b   : > { %v1131_v18 = vrot.slane %v1130_v16, 4 }
 0x23d   : > { %v1576_v21 = vpop.eup %1575  ;;  %v1132_v62 = vadd.f32 %v1131_v18, %v1130_v16 }
 0x23e   : > { %v1095_v23 = vmul.f32 %v1576_v21, %v1572_v25 }
 0x23f   : > { %v1133_v22 = vrot.slane %v1132_v62, 2 }
 0x240   : > { %v1129_v28 = vmul.f32 %v1898_v61, %v1095_v23  ;;  %v1150_v61 = vperm.slane %v1688_v26, 2 }
 0x241   : > { %v1134_v30 = vadd.f32 %v1133_v22, %v1132_v62 }
 0x242   : > { %v1137_v31 = vsel %vm755_vm2, %v1129_v28, 0.0 }
 0x243   : > { %v1138_v59 = vrot.slane %v1137_v31, 4  ;;  %v1135_v33 = vrot.slane %v1134_v30, 1 }
 0x245   : > { %v1139_v34 = vadd.f32 %v1138_v59, %v1137_v31  ;;  %v1136_v63 = vadd.f32 %v1135_v33, %v1134_v30 }
 0x247   : > { %v1140_v40 = vrot.slane %v1139_v34, 2  ;;  %v1144_v36 = vpack.c.bf16 %v1136_v63, %v1136_v63 }
 0x249   : > { %v1141_v35 = vadd.f32 %v1140_v40, %v1139_v34  ;;  %v1153_v38 = vunpack.c.l.b16 %v1144_v36 }
 0x24b   : > { %v1142_v19 = vrot.slane %v1141_v35, 1 }
 0x24d   : > { %v1143_v6 = vadd.f32 %v1142_v19, %v1141_v35 }
 0x24f   : > { %v1145_v17 = vpack.c.bf16 %v1143_v6, %v1143_v6 }
 0x251   : > { %v1154_v39 = vunpack.c.l.b16 %v1145_v17 }
 0x253   : > { %v1155_v57 = vsel %vm966_vm3, %v1154_v39, %v1153_v38 }
 0x254   : > { %v1156_v41 = vpack.c.b16 %v1155_v57, %v1155_v57 }
 0x256   : > { %1505 = vmatmul.msk.bf16.vlgmr.msrb.gmra.mxu2 %vm755_vm2, %v1156_v41 }
 0x2d9   : > { %v1181_v42 = vpop.f32.mrf.mxu2 }
 0x2da   : > { %v1182_v43 = vadd.f32 %v1181_v42, %v1150_v61 }
 0x2dc   : > { %1185 = vst [vmem:[%s380_s13] sm:$0x3] %v1182_v43 }
 0x2e1   : > { %v1183_v9 = vpop.f32.mrf.mxu2 }
 0x2e2 PF: > { %s18_s24 = sadd.s32 1, %s1583_s24  }
 0x2e3   : > { %p15_p4 = scmp.ge.s32.totalorder %s18_s24, 4  }
 0x2e5   :  { %17 = sbr.rel (!%p15_p4) target bundleno = 1 (0x1), region = 101 }

</bundles_post_ra>
